<compile_context>
chip_gen: v7x
topology: tpu7x:2x2x1
jax: 0.10.0
libtpu: 0.0.40
codegen_flags: <defaults>
</compile_context>

<pallas_src>
import functools

import jax
import jax.numpy as jnp
import numpy as np
from jax import lax
from jax.experimental import pallas as pl
from jax.experimental.pallas import tpu as pltpu


def _cdiv(a: int, b: int) -> int:
    return -(-a // b)


def _round_up(x: int, m: int) -> int:
    return _cdiv(x, m) * m


def _bce_hung_kernel(rowlim_ref, tn_ref, col_ref, p_ref, z_ref, out_ref,
                     *, tile_m: int, blocks_per_split: int, binary_z: bool):
    """Grid = (n_split, batch_blocks, m_blocks_per_split).

    rowlim_ref : (TB, 1) int32   min(src_ns, N1) * N2  (row-major flat row limit)
    tn_ref     : (TB, 1) int32   min(tgt_ns, N2)
    col_ref    : (1, TM) int32   precomputed flat_idx % N2 for this M-tile
    p_ref      : (TB, TM)        probability tile
    z_ref      : (TB, TM)        Hungarian matrix tile
    out_ref    : (1, TB, 1) f32  per-(split, batch) partial sum, resident over k
    """
    s = pl.program_id(0)
    k = pl.program_id(2)

    @pl.when(k == 0)
    def _():
        out_ref[...] = jnp.zeros_like(out_ref)

    p = p_ref[...].astype(jnp.float32)

    if binary_z:
        # Exact for z in {0, 1} (Hungarian matrix): one log instead of two.
        take_p = z_ref[...].astype(jnp.float32) >= 0.5
        bce = -jnp.maximum(jnp.log(jnp.where(take_p, p, 1.0 - p)), -100.0)
    else:
        # General (soft-target) BCE, matches torch for arbitrary z in [0, 1].
        z = z_ref[...].astype(jnp.float32)
        log_p = jnp.maximum(jnp.log(p), -100.0)
        log_1mp = jnp.maximum(jnp.log(1.0 - p), -100.0)
        bce = -(log_1mp + z * (log_p - log_1mp))

    # Logical (unclamped) flattened index of each element of this tile.  The
    # index_map clamps the *block* index so the DMA stays in bounds, but the
    # logical idx here keeps any duplicated / ragged lanes fully masked
    # (row_limit <= N1*N2 <= idx for those lanes).
    base = (s * blocks_per_split + k) * tile_m
    idx = base + lax.broadcasted_iota(jnp.int32, p.shape, 1)        # (TB, TM)
    mask = (idx < rowlim_ref[...]) & (col_ref[...] < tn_ref[...])   # (TB, TM)

    out_ref[...] += jnp.sum(jnp.where(mask, bce, 0.0),
                            axis=1, keepdims=True)[None]


def matching_loss_hung(pred_prob: jax.Array,
                       dis_pred: jax.Array,
                       src_ns: jax.Array,
                       tgt_ns: jax.Array,
                       *,
                       tile_m_cap: int = 32768,
                       assume_binary_targets: bool = True) -> jax.Array:
    """Pallas implementation of MatchingLossHung.forward.

    pred_prob: (B, N1, N2) float (f32 or bf16), values in [0, 1]
    dis_pred : (B, N1, N2) 0/1 Hungarian matrix (float / int8 / bool)
    src_ns   : (B,) int
    tgt_ns   : (B,) int
    returns  : (B,) float32 per-instance loss (NaN where src_ns == 0, as torch)
    """
    B, N1, N2 = pred_prob.shape
    M = N1 * N2

    # Lane-dense flatten (row-major): flat_idx = i * N2 + j.  Free reshape.
    p2 = pred_prob.reshape(B, M)
    z2 = dis_pred.reshape(B, M)

    # ---- tile sizes -------------------------------------------------------
    tile_b = min(32, _round_up(B, 8))                   # adaptive batch block
    if M <= tile_m_cap:
        tile_m = M                                      # full-dim lane block
    else:
        tile_m = _round_up(min(tile_m_cap, M), 128)
    num_m_blocks = _cdiv(M, tile_m)
    batch_blocks = _cdiv(B, tile_b)
    Bp = batch_blocks * tile_b

    # Optional 2-way split of the reduction axis as a *parallel* grid axis so
    # both v7x TensorCores are busy even with a single batch block.
    n_split = 2 if num_m_blocks >= 2 else 1
    blocks_per_split = _cdiv(num_m_blocks, n_split)

    # ---- tiny per-batch scalar inputs (padding these is ~free) ------------
    # Clamping to N1/N2 matches torch slicing (slice(n) with n > dim takes all)
    # and makes the in-kernel mask independent of a separate idx < M term.
    sn_clamped = jnp.minimum(src_ns.astype(jnp.int32), N1)
    tn_clamped = jnp.minimum(tgt_ns.astype(jnp.int32), N2)
    rowlim = jnp.pad(sn_clamped * N2, (0, Bp - B)).reshape(Bp, 1)   # pad 0 -> masked
    tn = jnp.pad(tn_clamped, (0, Bp - B)).reshape(Bp, 1)            # pad 0 -> masked
    # Precomputed column index avoids in-kernel vector int div/mod.
    col = (jnp.arange(M, dtype=jnp.int32) % N2).reshape(1, M)

    # ---- grid / specs ------------------------------------------------------
    grid = (n_split, batch_blocks, blocks_per_split)

    def _m_block(s, k):
        # Clamp so the DMA never targets a fully out-of-bounds block (the
        # duplicated block, if any, is fully masked in the kernel).
        return jnp.minimum(s * blocks_per_split + k, num_m_blocks - 1)

    in_specs = [
        pl.BlockSpec((tile_b, 1), lambda s, i, k: (i, 0)),                    # rowlim
        pl.BlockSpec((tile_b, 1), lambda s, i, k: (i, 0)),                    # tn
        pl.BlockSpec((1, tile_m), lambda s, i, k: (0, _m_block(s, k))),       # col
        pl.BlockSpec((tile_b, tile_m), lambda s, i, k: (i, _m_block(s, k))),  # P
        pl.BlockSpec((tile_b, tile_m), lambda s, i, k: (i, _m_block(s, k))),  # Z
    ]
    out_specs = pl.BlockSpec((1, tile_b, 1), lambda s, i, k: (s, i, 0))
    out_shape = jax.ShapeDtypeStruct((n_split, Bp, 1), jnp.float32)

    # VMEM budget: double-buffered P + Z tiles + the small col tile, plus slack.
    block_bytes = tile_b * tile_m * (p2.dtype.itemsize + z2.dtype.itemsize) \
        + tile_m * 4
    vmem_limit = int(min(max(2 * block_bytes + (4 << 20), 16 << 20), 40 << 20))

    kernel = functools.partial(_bce_hung_kernel,
                               tile_m=tile_m,
                               blocks_per_split=blocks_per_split,
                               binary_z=assume_binary_targets)

    parts = pl.pallas_call(
        kernel,
        out_shape=out_shape,
        grid_spec=pltpu.PrefetchScalarGridSpec(
            num_scalar_prefetch=0,
            grid=grid,
            in_specs=in_specs,
            out_specs=out_specs,
        ),
        compiler_params=pltpu.CompilerParams(
            dimension_semantics=("parallel", "parallel", "arbitrary"),
            vmem_limit_bytes=vmem_limit),
    )(rowlim, tn, col, p2, z2)

    # Combine the (at most 2) partial sums and divide by the *unclamped* src_ns
    # exactly as torch does (0/0 -> NaN when src_ns == 0).
    total = parts.sum(axis=0)[:B, 0]
    return total / src_ns.astype(jnp.float32)


def _reference(pred_prob, dis_pred, src_ns, tgt_ns):
    """Pure-JAX reference mirroring the PyTorch per-batch loop."""
    B = pred_prob.shape[0]
    losses = []
    for b in range(B):
        s = int(src_ns[b])
        t = int(tgt_ns[b])
        p = pred_prob[b, :s, :t].astype(jnp.float32)
        z = dis_pred[b, :s, :t].astype(jnp.float32)
        log_p = jnp.maximum(jnp.log(p), -100.0)
        log_1mp = jnp.maximum(jnp.log(1.0 - p), -100.0)
        bce = -(z * log_p + (1.0 - z) * log_1mp)
        losses.append(jnp.sum(bce) / s)
    return jnp.stack(losses)


if __name__ == "__main__":
    key = jax.random.PRNGKey(0)

    # ---- Test 1: small typical shapes (single block everywhere) ----
    B, N1, N2 = 2, 8, 8
    k1, k2 = jax.random.split(key)
    pred_prob = jax.random.uniform(k1, (B, N1, N2), dtype=jnp.float32,
                                   minval=1e-4, maxval=1.0 - 1e-4)
    perm0 = jnp.eye(N1, N2, dtype=jnp.float32)
    perm1 = jnp.roll(jnp.eye(N1, N2, dtype=jnp.float32), shift=2, axis=1)
    dis_pred = jnp.stack([perm0, perm1], axis=0)
    src_ns = jnp.array([6, 8], dtype=jnp.int32)
    tgt_ns = jnp.array([7, 8], dtype=jnp.int32)

    loss = jax.block_until_ready(
        matching_loss_hung(pred_prob, dis_pred, src_ns, tgt_ns))
    ref = _reference(pred_prob, dis_pred, src_ns, tgt_ns)
    np.testing.assert_allclose(np.asarray(loss), np.asarray(ref),
                               rtol=1e-5, atol=1e-5)

    # ---- Test 2: ragged batch block + odd M-tile count + 2-way M split ----
    B2, M1, M2 = 9, 24, 16          # M = 384, tile_m_cap=128 -> 3 tiles (odd)
    k3, k4, k5, k6 = jax.random.split(key, 4)
    pred2 = jax.random.uniform(k3, (B2, M1, M2), dtype=jnp.float32,
                               minval=1e-4, maxval=1.0 - 1e-4)
    z2 = (jax.random.uniform(k4, (B2, M1, M2)) < 0.1).astype(jnp.float32)
    src2 = jax.random.randint(k5, (B2,), 1, M1 + 1, dtype=jnp.int32)
    tgt2 = jax.random.randint(k6, (B2,), 1, M2 + 1, dtype=jnp.int32)

    loss2 = jax.block_until_ready(
        matching_loss_hung(pred2, z2, src2, tgt2, tile_m_cap=128))
    ref2 = _reference(pred2, z2, src2, tgt2)
    np.testing.assert_allclose(np.asarray(loss2), np.asarray(ref2),
                               rtol=1e-5, atol=1e-5)

    # ---- Test 3: soft targets (two-log fallback path) ----
    k7 = jax.random.fold_in(key, 7)
    z_soft = jax.random.uniform(k7, (B2, M1, M2), dtype=jnp.float32)
    loss3 = jax.block_until_ready(
        matching_loss_hung(pred2, z_soft, src2, tgt2, tile_m_cap=128,
                           assume_binary_targets=False))
    ref3 = _reference(pred2, z_soft, src2, tgt2)
    np.testing.assert_allclose(np.asarray(loss3), np.asarray(ref3),
                               rtol=1e-5, atol=1e-5)

    print("KERNEL_OK")
</pallas_src>

<mosaic_0001>
module attributes {stable_mosaic.version = 11 : i64} {
  func.func @_bce_hung_kernel(%arg0: i32, %arg1: i32, %arg2: i32, %arg3: memref<8x1xi32, #tpu.memory_space<vmem>>, %arg4: memref<8x1xi32, #tpu.memory_space<vmem>>, %arg5: memref<1x64xi32, #tpu.memory_space<vmem>>, %arg6: memref<8x64xf32, #tpu.memory_space<vmem>>, %arg7: memref<8x64xf32, #tpu.memory_space<vmem>>, %arg8: memref<1x8x1xf32, #tpu.memory_space<vmem>>) attributes {dimension_semantics = [#tpu.dimension_semantics<parallel>, #tpu.dimension_semantics<parallel>, #tpu.dimension_semantics<arbitrary>], iteration_bounds = array<i64: 1, 1, 1>, scalar_prefetch = 0 : i64, scratch_operands = 0 : i64, tpu.core_type = #tpu.core_type<tc>, window_params = [{transform_indices = @transform_0, window_bounds = array<i64: 8, 1>}, {transform_indices = @transform_1, window_bounds = array<i64: 8, 1>}, {transform_indices = @transform_2, window_bounds = array<i64: 1, 64>}, {transform_indices = @transform_3, window_bounds = array<i64: 8, 64>}, {transform_indices = @transform_4, window_bounds = array<i64: 8, 64>}, {transform_indices = @transform_5, window_bounds = array<i64: 1, 8, 1>}]} {
    %c0_i32 = arith.constant 0 : i32
    %0 = arith.cmpi eq, %arg2, %c0_i32 : i32
    %1 = arith.extui %0 : i1 to i32
    %c0_i32_0 = arith.constant 0 : i32
    %2 = arith.cmpi ne, %1, %c0_i32_0 : i32
    scf.if %2 {
      %cst_21 = arith.constant 0.000000e+00 : f32
      %38 = vector.broadcast %cst_21 : f32 to vector<1x8x1xf32>
      %c0_22 = arith.constant 0 : index
      %c0_23 = arith.constant 0 : index
      %c0_24 = arith.constant 0 : index
      %39 = vector.load %arg8[%c0_22, %c0_23, %c0_24] : memref<1x8x1xf32, #tpu.memory_space<vmem>>, vector<1x8x1xf32>
      tpu.vector_store %arg8[%c0_22, %c0_23, %c0_24], %38 {strides = array<i32>} : memref<1x8x1xf32, #tpu.memory_space<vmem>>, vector<1x8x1xf32>,
    } else {
    }
    %c0 = arith.constant 0 : index
    %c0_1 = arith.constant 0 : index
    %3 = vector.load %arg6[%c0, %c0_1] : memref<8x64xf32, #tpu.memory_space<vmem>>, vector<8x64xf32>
    %c0_2 = arith.constant 0 : index
    %c0_3 = arith.constant 0 : index
    %4 = vector.load %arg7[%c0_2, %c0_3] : memref<8x64xf32, #tpu.memory_space<vmem>>, vector<8x64xf32>
    %cst = arith.constant 5.000000e-01 : f32
    %5 = vector.broadcast %cst : f32 to vector<8x64xf32>
    %6 = arith.cmpf oge, %4, %5 : vector<8x64xf32>
    %cst_4 = arith.constant 1.000000e+00 : f32
    %7 = vector.broadcast %cst_4 : f32 to vector<8x64xf32>
    %8 = arith.subf %7, %3 : vector<8x64xf32>
    %9 = arith.select %6, %3, %8 : vector<8x64xi1>, vector<8x64xf32>
    %10 = math.log %9 : vector<8x64xf32>
    %cst_5 = arith.constant -1.000000e+02 : f32
    %11 = vector.broadcast %cst_5 : f32 to vector<8x64xf32>
    %12 = arith.maximumf %10, %11 : vector<8x64xf32>
    %cst_6 = arith.constant 0.000000e+00 : f32
    %13 = vector.broadcast %cst_6 : f32 to vector<8x64xf32>
    %14 = arith.subf %13, %12 : vector<8x64xf32>
    %c1_i32 = arith.constant 1 : i32
    %15 = arith.muli %arg0, %c1_i32 : i32
    %16 = arith.addi %15, %arg2 : i32
    %c64_i32 = arith.constant 64 : i32
    %17 = arith.muli %16, %c64_i32 : i32
    %18 = tpu.iota {dimensions = array<i32: 1>} : vector<8x64xi32>
    %19 = vector.broadcast %17 : i32 to vector<8x64xi32>
    %20 = arith.addi %19, %18 : vector<8x64xi32>
    %c0_7 = arith.constant 0 : index
    %c0_8 = arith.constant 0 : index
    %21 = vector.load %arg3[%c0_7, %c0_8] : memref<8x1xi32, #tpu.memory_space<vmem>>, vector<8x1xi32>
    %22 = vector.broadcast %21 : vector<8x1xi32> to vector<8x64xi32>
    %23 = arith.cmpi slt, %20, %22 : vector<8x64xi32>
    %c0_9 = arith.constant 0 : index
    %c0_10 = arith.constant 0 : index
    %24 = vector.load %arg5[%c0_9, %c0_10] : memref<1x64xi32, #tpu.memory_space<vmem>>, vector<1x64xi32>
    %c0_11 = arith.constant 0 : index
    %c0_12 = arith.constant 0 : index
    %25 = vector.load %arg4[%c0_11, %c0_12] : memref<8x1xi32, #tpu.memory_space<vmem>>, vector<8x1xi32>
    %26 = vector.broadcast %24 : vector<1x64xi32> to vector<8x64xi32>
    %27 = vector.broadcast %25 : vector<8x1xi32> to vector<8x64xi32>
    %28 = arith.cmpi slt, %26, %27 : vector<8x64xi32>
    %29 = arith.andi %23, %28 : vector<8x64xi1>
    %c0_13 = arith.constant 0 : index
    %c0_14 = arith.constant 0 : index
    %c0_15 = arith.constant 0 : index
    %30 = vector.load %arg8[%c0_13, %c0_14, %c0_15] : memref<1x8x1xf32, #tpu.memory_space<vmem>>, vector<1x8x1xf32>
    %cst_16 = arith.constant 0.000000e+00 : f32
    %31 = vector.broadcast %cst_16 : f32 to vector<8x64xf32>
    %32 = arith.select %29, %14, %31 : vector<8x64xi1>, vector<8x64xf32>
    %cst_17 = arith.constant dense<0.000000e+00> : vector<8xf32>
    %33 = vector.multi_reduction <add>, %32, %cst_17 [1] : vector<8x64xf32> to vector<8xf32>
    %34 = vector.shape_cast %33 : vector<8xf32> to vector<8x1xf32>
    %35 = vector.shape_cast %34 : vector<8x1xf32> to vector<1x8x1xf32>
    %36 = arith.addf %30, %35 : vector<1x8x1xf32>
    %c0_18 = arith.constant 0 : index
    %c0_19 = arith.constant 0 : index
    %c0_20 = arith.constant 0 : index
    %37 = vector.load %arg8[%c0_18, %c0_19, %c0_20] : memref<1x8x1xf32, #tpu.memory_space<vmem>>, vector<1x8x1xf32>
    tpu.vector_store %arg8[%c0_18, %c0_19, %c0_20], %36 {strides = array<i32>} : memref<1x8x1xf32, #tpu.memory_space<vmem>>, vector<1x8x1xf32>,
    return
  }
  func.func @transform_0(%arg0: i32, %arg1: i32, %arg2: i32) -> (i32, i32) {
    %c0_i32 = arith.constant 0 : i32
    %c0_i32_0 = arith.constant 0 : i32
    return %arg1, %c0_i32 : i32, i32
  }
  func.func @transform_1(%arg0: i32, %arg1: i32, %arg2: i32) -> (i32, i32) {
    %c0_i32 = arith.constant 0 : i32
    %c0_i32_0 = arith.constant 0 : i32
    return %arg1, %c0_i32 : i32, i32
  }
  func.func @transform_2(%arg0: i32, %arg1: i32, %arg2: i32) -> (i32, i32) {
    %c1_i32 = arith.constant 1 : i32
    %0 = arith.muli %arg0, %c1_i32 : i32
    %1 = arith.addi %0, %arg2 : i32
    %c0_i32 = arith.constant 0 : i32
    %2 = arith.minsi %1, %c0_i32 : i32
    %c0_i32_0 = arith.constant 0 : i32
    %c0_i32_1 = arith.constant 0 : i32
    return %c0_i32_0, %2 : i32, i32
  }
  func.func @transform_3(%arg0: i32, %arg1: i32, %arg2: i32) -> (i32, i32) {
    %c1_i32 = arith.constant 1 : i32
    %0 = arith.muli %arg0, %c1_i32 : i32
    %1 = arith.addi %0, %arg2 : i32
    %c0_i32 = arith.constant 0 : i32
    %2 = arith.minsi %1, %c0_i32 : i32
    %c0_i32_0 = arith.constant 0 : i32
    return %arg1, %2 : i32, i32
  }
  func.func @transform_4(%arg0: i32, %arg1: i32, %arg2: i32) -> (i32, i32) {
    %c1_i32 = arith.constant 1 : i32
    %0 = arith.muli %arg0, %c1_i32 : i32
    %1 = arith.addi %0, %arg2 : i32
    %c0_i32 = arith.constant 0 : i32
    %2 = arith.minsi %1, %c0_i32 : i32
    %c0_i32_0 = arith.constant 0 : i32
    return %arg1, %2 : i32, i32
  }
  func.func @transform_5(%arg0: i32, %arg1: i32, %arg2: i32) -> (i32, i32, i32) {
    %c0_i32 = arith.constant 0 : i32
    %c0_i32_0 = arith.constant 0 : i32
    return %arg0, %arg1, %c0_i32 : i32, i32, i32
  }
}

</mosaic_0001>

<bundles_post_ra>
// kernel: tpu_custom_call.1
= control target key start
LH: loop header
LB: loop body
LE: loop exit
PB: predicated region body
PF: predicated region fallthrough
CT: control target
= control target key end

     0   :  { %v169_v0 = vmov 0   ;;  %vm102_vm0 = vcmask 7168   ;;  %v170_v3 = vmov 0.0   ;;  %v115_v10 = vlaneseq  ;;  %s227_s0 = inlined_call_operand.vmem [shape: s32[8,1], index: 0, kind: input, shape index: {}]   ;;  %s228_s1 = inlined_call_operand.vmem [shape: s32[8,1], index: 1, kind: input, shape index: {}]   ;;  %s229_s5 = inlined_call_operand.vmem [shape: f32[1,8,1], index: 5, kind: output, shape index: {}]   ;;  %s230_s3 = inlined_call_operand.vmem [shape: f32[2,64], index: 3, kind: input, shape index: {}]   ;;  %s231_s4 = inlined_call_operand.vmem [shape: f32[2,64], index: 4, kind: input, shape index: {}]   ;;  %s232_s2 = inlined_call_operand.vmem [shape: s32[1,64], index: 2, kind: input, shape index: {}]  }
   0x1   :  { %166 = vset.pattern.permute.xlu0 %v169_v0  ;;  %v119_v1 = vld [vmem:[%s227_s0] sm:$0xff]  ;;  %103 = vst.msk [vmem:[%s229_s5] sm:$0xff] %vm102_vm0, %v170_v3  ;;  %vm137_vm4 = vcmask 523264  }
   0x2   :  { %121 = vperm.xlu0 %166, %v119_v1   ;;  %v125_v2 = vld [vmem:[%s228_s1] sm:$0xff]  ;;  %v116_v13 = vand.u32 127, %v115_v10 }
   0x3   :  { %v104_v4 = vld [vmem:[%s230_s3] sm:$0xff] }
   0x4   :  { %v105_v5 = vld [vmem:[%s231_s4] sm:$0xff]  ;;  %v107_v6 = vsub.f32 1.0, %v104_v4 }
   0x5   :  { %vm106_vm1 = vcmp.ge.f32.partialorder %v105_v5, 0.5  ;;  %v163_v14 = vld [vmem:[%s232_s2] ss:$0 sm:$0xff] }
   0x6   :  { %131 = vperm.xlu0 %166, %v125_v2   ;;  %v108_v7 = vsel %vm106_vm1, %v104_v4, %v107_v6 }
   0x7   :  { %167 = vlog2.f32 %v108_v7 }
   0x8   :  { %v135_v19 = vld [vmem:[%s229_s5] sm:$0xff] }
  0x11   :  { %v168_v8 = vpop.eup %167 }
  0x12   :  { %v110_v9 = vmul.f32 0.6931472, %v168_v8 }
  0x14   :  { %v111_v11 = vmax.f32 %v110_v9, -100.0 }
  0x16   :  { %v112_v15 = vsub.f32 0.0, %v111_v11 }
  0x81   :  { %v122_v12 = vpop.permute.xlu0 %121 }
  0x82   :  { %vm123_vm2 = vcmp.lt.s32.totalorder %v116_v13, %v122_v12 }
  0x85   :  { %v132_v16 = vpop.permute.xlu0 %131 }
  0x86   :  { %vm133_vm3 = vcmp.lt.s32.totalorder %v163_v14, %v132_v16 }
  0x87   :  { %vm134_vm5 = vmand %vm123_vm2, %vm133_vm3 }
  0x88   :  { %v136_v17 = vsel %vm134_vm5, %v112_v15, 0.0 }
  0x89   :  { %v138_v18 = vsel %vm137_vm4, %v136_v17, 0.0 }
  0x8a   :  { %139 = vadd.xlane.f32.xlu1 %v138_v18 }
 0x117   :  { %v140_v20 = vpop.xlane.xlu1 %139 }
 0x118   :  { %v141_v21 = vadd.f32 %v140_v20, %v135_v19 }
 0x11a   :  { %143 = vst.msk [vmem:[%s229_s5] sm:$0xff] %vm102_vm0, %v141_v21 }

</bundles_post_ra>
